<compile_context>
chip_gen: v6e
topology: v6e:2x2x1
jax: 0.10.0
libtpu: 0.0.40
codegen_flags: <defaults>
</compile_context>

<pallas_src>
import jax
import jax.numpy as jnp
from jax.experimental import pallas as pl
from jax.experimental.pallas import tpu as pltpu


def _se_kernel(x_ref, w1t_ref, w2t_ref, o_ref):
    """One grid step over a (TB, HW, C) slab."""
    x = x_ref[...].astype(jnp.float32)                 # (TB, HW, C)
    hw = x.shape[1]

    # Squeeze: global average pool over spatial (sublane-axis reduce).
    pooled = jnp.sum(x, axis=1) * (1.0 / hw)           # (TB, C)

    # FC1 (C -> hidden_padded) + ReLU.
    h = jnp.dot(pooled, w1t_ref[...].astype(jnp.float32),
                preferred_element_type=jnp.float32)
    h = jnp.maximum(h, 0.0)                            # (TB, Hp)

    # FC2 (hidden_padded -> C) + Sigmoid.
    s = jnp.dot(h, w2t_ref[...].astype(jnp.float32),
                preferred_element_type=jnp.float32)
    s = jax.nn.sigmoid(s)                              # (TB, C)

    # Excitation: per-channel scale broadcast across spatial (sublanes).
    o_ref[...] = (x * s[:, None, :]).astype(o_ref.dtype)


def _vmem_capacity_bytes():
    """Physical VMEM of the current chip; conservative fallback (v7x per-TC)."""
    try:
        cap = getattr(pltpu.get_tpu_info(), "vmem_capacity_bytes", None)
        if cap:
            return int(cap)
    except Exception:
        pass
    return 64 * 1024 * 1024


def _choose_tb(B, HW, C, itemsize, vmem_budget_bytes):
    """Pick the batch tile: big enough to amortize step cost, small enough for
    VMEM (double-buffered in + out slabs + f32 temporaries), and leaving
    >= min(B, 4) grid steps for megacore sharding / pipelining."""
    per_item = HW * C * (4 * itemsize + 8)          # 2x in + 2x out bufs + f32 temps
    tb_vmem = max(1, vmem_budget_bytes // per_item)
    min_grid = min(B, 4)
    tb_grid = max(1, B // min_grid)
    tb_max = int(min(B, tb_vmem, tb_grid))
    # Largest divisor of B not exceeding tb_max -> exact blocks, no masking.
    for tb in range(tb_max, 0, -1):
        if B % tb == 0:
            return tb
    return 1


def se_layer(x, w1, w2):
    """SELayer forward.

    x:  (B, C, H, W)       input feature map (f32 or bf16)
    w1: (hidden, C)        first Linear weight  (PyTorch (out, in) layout)
    w2: (C, hidden)        second Linear weight
    returns (B, C, H, W)
    """
    B, C, H, W = x.shape
    HW = H * W
    hidden = w1.shape[0]

    # Zero-pad the bottleneck dim to >= 8 (exact; see kernel comment).
    hp = max(8, ((hidden + 7) // 8) * 8)
    w1t = jnp.zeros((C, hp), jnp.float32).at[:, :hidden].set(
        w1.T.astype(jnp.float32))
    w2t = jnp.zeros((hp, C), jnp.float32).at[:hidden, :].set(
        w2.T.astype(jnp.float32))

    # Lane-dense slab layout: channels on the lane axis, spatial on sublanes.
    x_slab = x.transpose(0, 2, 3, 1).reshape(B, HW, C)

    vmem_cap = _vmem_capacity_bytes()
    vmem_limit = (vmem_cap * 3) // 4                # headroom (48 MiB on v7x)
    tb = _choose_tb(B, HW, C, x.dtype.itemsize, vmem_limit // 2)
    grid = B // tb
    # TODO(synk): if even TB=1 exceeds the VMEM budget (very large C*HW), fall
    # back to a two-pass grid over HW tiles (pool-accumulate, then scale).

    out_slab = pl.pallas_call(
        _se_kernel,
        out_shape=jax.ShapeDtypeStruct((B, HW, C), x.dtype),
        grid_spec=pltpu.PrefetchScalarGridSpec(
            num_scalar_prefetch=0,
            grid=(grid,),
            in_specs=[
                pl.BlockSpec((tb, HW, C), lambda b: (b, 0, 0)),
                pl.BlockSpec((C, hp), lambda b: (0, 0)),
                pl.BlockSpec((hp, C), lambda b: (0, 0)),
            ],
            out_specs=pl.BlockSpec((tb, HW, C), lambda b: (b, 0, 0)),
        ),
        compiler_params=pltpu.CompilerParams(
            dimension_semantics=("parallel",),
            vmem_limit_bytes=int(vmem_limit),
        ),
    )(x_slab, w1t, w2t)

    return out_slab.reshape(B, H, W, C).transpose(0, 3, 1, 2)


def se_layer_ref(x, w1, w2):
    """Pure-JAX reference matching the PyTorch module."""
    y = jnp.mean(x, axis=(2, 3))                      # (B, C)
    y = jnp.maximum(y @ w1.T, 0.0)                    # (B, hidden)
    y = jax.nn.sigmoid(y @ w2.T)                      # (B, C)
    return x * y[:, :, None, None]


if __name__ == "__main__":
    # Small shapes consistent with the module: channel=32, reduction=16 -> hidden=2.
    B, C, H, W = 2, 32, 16, 16
    reduction = 16
    hidden = C // reduction

    key = jax.random.PRNGKey(0)
    kx, k1, k2 = jax.random.split(key, 3)
    x = jax.random.normal(kx, (B, C, H, W), dtype=jnp.float32)
    # PyTorch Linear weight layout: (out_features, in_features), bias-free.
    w1 = jax.random.normal(k1, (hidden, C), dtype=jnp.float32) * 0.1
    w2 = jax.random.normal(k2, (C, hidden), dtype=jnp.float32) * 0.1

    out = jax.block_until_ready(se_layer(x, w1, w2))
    ref = se_layer_ref(x, w1, w2)

    assert out.shape == (B, C, H, W)
    assert jnp.allclose(out, ref, atol=1e-5, rtol=1e-5), "mismatch vs reference"
    print("KERNEL_OK")
</pallas_src>

<mosaic_0001>
module attributes {stable_mosaic.version = 11 : i64} {
  func.func @_se_kernel(%arg0: i32, %arg1: memref<1x256x32xf32, #tpu.memory_space<vmem>>, %arg2: memref<32x8xf32, #tpu.memory_space<vmem>>, %arg3: memref<8x32xf32, #tpu.memory_space<vmem>>, %arg4: memref<1x256x32xf32, #tpu.memory_space<vmem>>) attributes {dimension_semantics = [#tpu.dimension_semantics<parallel>], iteration_bounds = array<i64: 2>, scalar_prefetch = 0 : i64, scratch_operands = 0 : i64, tpu.core_type = #tpu.core_type<tc>, window_params = [{transform_indices = @transform_0, window_bounds = array<i64: 1, 256, 32>}, {pipeline_mode = #tpu.pipeline_mode<synchronous>, transform_indices = @transform_1, window_bounds = array<i64: 32, 8>}, {pipeline_mode = #tpu.pipeline_mode<synchronous>, transform_indices = @transform_2, window_bounds = array<i64: 8, 32>}, {transform_indices = @transform_3, window_bounds = array<i64: 1, 256, 32>}]} {
    %c0 = arith.constant 0 : index
    %c0_0 = arith.constant 0 : index
    %c0_1 = arith.constant 0 : index
    %0 = vector.load %arg1[%c0, %c0_0, %c0_1] : memref<1x256x32xf32, #tpu.memory_space<vmem>>, vector<1x256x32xf32>
    %cst = arith.constant dense<0.000000e+00> : vector<1x32xf32>
    %1 = vector.multi_reduction <add>, %0, %cst [1] : vector<1x256x32xf32> to vector<1x32xf32>
    %cst_2 = arith.constant 3.906250e-03 : f32
    %2 = vector.broadcast %cst_2 : f32 to vector<1x32xf32>
    %3 = arith.mulf %1, %2 : vector<1x32xf32>
    %c0_3 = arith.constant 0 : index
    %c0_4 = arith.constant 0 : index
    %4 = vector.load %arg2[%c0_3, %c0_4] : memref<32x8xf32, #tpu.memory_space<vmem>>, vector<32x8xf32>
    %cst_5 = arith.constant dense<0.000000e+00> : vector<1x8xf32>
    %5 = tpu.matmul %3, %4, %cst_5 {dimension_numbers = #tpu.dot_dimension_numbers<[1], [0], [0], [1], [0, 0, 1, 1], [], []>} : vector<1x32xf32>, vector<32x8xf32>, vector<1x8xf32> -> vector<1x8xf32>
    %cst_6 = arith.constant 0.000000e+00 : f32
    %6 = vector.broadcast %cst_6 : f32 to vector<1x8xf32>
    %7 = arith.maximumf %5, %6 : vector<1x8xf32>
    %c0_7 = arith.constant 0 : index
    %c0_8 = arith.constant 0 : index
    %8 = vector.load %arg3[%c0_7, %c0_8] : memref<8x32xf32, #tpu.memory_space<vmem>>, vector<8x32xf32>
    %cst_9 = arith.constant dense<0.000000e+00> : vector<1x32xf32>
    %9 = tpu.matmul %7, %8, %cst_9 {dimension_numbers = #tpu.dot_dimension_numbers<[1], [0], [0], [1], [0, 0, 1, 1], [], []>} : vector<1x8xf32>, vector<8x32xf32>, vector<1x32xf32> -> vector<1x32xf32>
    %10 = arith.negf %9 : vector<1x32xf32>
    %11 = math.exp %10 : vector<1x32xf32>
    %cst_10 = arith.constant 1.000000e+00 : f32
    %12 = vector.broadcast %cst_10 : f32 to vector<1x32xf32>
    %13 = arith.addf %12, %11 : vector<1x32xf32>
    %14 = arith.divf %12, %13 : vector<1x32xf32>
    %15 = vector.shape_cast %14 : vector<1x32xf32> to vector<1x1x32xf32>
    %16 = vector.broadcast %15 : vector<1x1x32xf32> to vector<1x256x32xf32>
    %17 = arith.mulf %0, %16 : vector<1x256x32xf32>
    %c0_11 = arith.constant 0 : index
    %c0_12 = arith.constant 0 : index
    %c0_13 = arith.constant 0 : index
    %18 = vector.load %arg4[%c0_11, %c0_12, %c0_13] : memref<1x256x32xf32, #tpu.memory_space<vmem>>, vector<1x256x32xf32>
    tpu.vector_store %arg4[%c0_11, %c0_12, %c0_13], %17 {strides = array<i32>} : memref<1x256x32xf32, #tpu.memory_space<vmem>>, vector<1x256x32xf32>,
    return
  }
  func.func @transform_0(%arg0: i32) -> (i32, i32, i32) {
    %c0_i32 = arith.constant 0 : i32
    %c0_i32_0 = arith.constant 0 : i32
    %c0_i32_1 = arith.constant 0 : i32
    return %arg0, %c0_i32, %c0_i32_0 : i32, i32, i32
  }
  func.func @transform_1(%arg0: i32) -> (i32, i32) {
    %c0_i32 = arith.constant 0 : i32
    %c0_i32_0 = arith.constant 0 : i32
    %c0_i32_1 = arith.constant 0 : i32
    return %c0_i32, %c0_i32_0 : i32, i32
  }
  func.func @transform_2(%arg0: i32) -> (i32, i32) {
    %c0_i32 = arith.constant 0 : i32
    %c0_i32_0 = arith.constant 0 : i32
    %c0_i32_1 = arith.constant 0 : i32
    return %c0_i32, %c0_i32_0 : i32, i32
  }
  func.func @transform_3(%arg0: i32) -> (i32, i32, i32) {
    %c0_i32 = arith.constant 0 : i32
    %c0_i32_0 = arith.constant 0 : i32
    %c0_i32_1 = arith.constant 0 : i32
    return %arg0, %c0_i32, %c0_i32_0 : i32, i32, i32
  }
}

</mosaic_0001>

<bundles_post_ra>
// kernel: tpu_custom_call.1
= control target key start
LH: loop header
LB: loop body
LE: loop exit
PB: predicated region body
PF: predicated region fallthrough
CT: control target
= control target key end

     0   :  { %s639_s12 = smov 0   ;;  %s939_s0 = inlined_call_operand.vmem [shape: f32[2,256,32], index: 0, kind: input, shape index: {}]   ;;  %s940_s1 = inlined_call_operand.vmem [shape: f32[32,8], index: 1, kind: input, shape index: {}]   ;;  %s941_s2 = inlined_call_operand.vmem [shape: f32[8,32], index: 2, kind: input, shape index: {}]   ;;  %s942_s3 = inlined_call_operand.vmem [shape: f32[2,256,32], index: 3, kind: output, shape index: {}]  }
   0x1 LB: > { %s556_s13 = sadd.s32 4294967295, %s615_s12   ;;  %p560_p0 = scmp.ge.s32.totalorder %s615_s12, 1  ;;  %s615_s12 = sphi %s639_s12, %s13_s12  }
   0x2   : > { %p137_p1 = scmp.lt.s32.totalorder %s615_s12, 3 }
   0x4   : > { %p138_p2 = pnand %p560_p0, %p137_p1 }
   0x5   : > { %p161_p3 = scmp.lt.s32.totalorder (!%p138_p2), %s556_s13, 1 }
   0x6   : > { %141 = sbr.rel (%p138_p2) target bundleno = 533 (0x215), region = 32 }
   0xb   : > { %v277_v0 = vld [vmem:[%s940_s1 + $0x18] sm:$0xff]  ;;  %v617_v1 = vmov 0.0   ;;  %v276_v2 = vld [vmem:[%s940_s1 + $0x10] sm:$0xff]  ;;  %vm618_vm0 = vmmov 0   ;;  %s944_s13 = smov (!%p161_p3, %s556_s13), 1  ;;  %v275_v3 = vld [vmem:[%s940_s1 + $0x8] sm:$0xff] }
   0xc   : > { %579 = vmatprep.subr.mxu0 %v617_v1  ;;  %587 = vmatprep.mubr.msk.f32.mxu0 %vm618_vm0, %v617_v1  ;;  %s570_s20 = sshll.u32 %s944_s13, 8  ;;  %vm203_vm1 = vcmask 261120   ;;  %v274_v4 = vld [vmem:[%s940_s1] sm:$0xff]  ;;  %vm353_vm2 = vcmask 64512  }
   0xd   : > { %580 = vmatpush3.msra.mxu0 %v277_v0  ;;  %590 = vmatprep.subr.mxu1 %v617_v1  ;;  %s667_s25 = scalar_lea.vmem %s939_s0, %s570_s20  ;;  %s838_s30 = scalar_lea.vmem %s942_s3, %s570_s20 }
   0xe   : > { %581 = vmatprep.subr.mxu0 %v617_v1  ;;  %592 = vmatprep.mubr.msk.f32.mxu1 %vm618_vm0, %v617_v1  ;;  %v670_v5 = vld [vmem:[%s667_s25] sm:$0xff]  ;;  %v673_v6 = vld [vmem:[%s667_s25 + $0x8] sm:$0xff]  ;;  %v676_v7 = vld [vmem:[%s667_s25 + $0x10] sm:$0xff] }
   0xf   : > { %582 = vmatpush3.msra.mxu0 %v276_v2  ;;  %v679_v8 = vld [vmem:[%s667_s25 + $0x18] sm:$0xff]  ;;  %v204_v9 = vsel %vm203_vm1, %v670_v5, 0.0  ;;  %v205_v10 = vsel %vm203_vm1, %v673_v6, 0.0  ;;  %v207_v11 = vsel %vm203_vm1, %v676_v7, 0.0  ;;  %v688_v12 = vld [vmem:[%s667_s25 + $0x20] sm:$0xff]  ;;  %v693_v15 = vld [vmem:[%s667_s25 + $0x28] sm:$0xff] }
  0x10   : > { %583 = vmatprep.subr.mxu0 %v617_v1  ;;  %v206_v13 = vadd.f32 %v205_v10, %v204_v9  ;;  %v209_v14 = vsel %vm203_vm1, %v679_v8, 0.0  ;;  %v211_v17 = vsel %vm203_vm1, %v688_v12, 0.0  ;;  %v698_v18 = vld [vmem:[%s667_s25 + $0x30] sm:$0xff]  ;;  %v213_v20 = vsel %vm203_vm1, %v693_v15, 0.0  ;;  %v703_v21 = vld [vmem:[%s667_s25 + $0x38] sm:$0xff]  ;;  %v708_v24 = vld [vmem:[%s667_s25 + $0x40] sm:$0xff] }
  0x11   : > { %584 = vmatpush3.msra.mxu0 %v275_v3  ;;  %v215_v23 = vsel %vm203_vm1, %v698_v18, 0.0  ;;  %v217_v26 = vsel %vm203_vm1, %v703_v21, 0.0  ;;  %v713_v27 = vld [vmem:[%s667_s25 + $0x48] sm:$0xff]  ;;  %v219_v29 = vsel %vm203_vm1, %v708_v24, 0.0  ;;  %v718_v30 = vld [vmem:[%s667_s25 + $0x50] sm:$0xff]  ;;  %v723_v33 = vld [vmem:[%s667_s25 + $0x58] sm:$0xff] }
  0x12   : > { %585 = vmatprep.subr.mxu0 %v617_v1  ;;  %v208_v16 = vadd.f32 %v207_v11, %v206_v13  ;;  %v221_v32 = vsel %vm203_vm1, %v713_v27, 0.0  ;;  %v223_v35 = vsel %vm203_vm1, %v718_v30, 0.0  ;;  %v728_v36 = vld [vmem:[%s667_s25 + $0x60] sm:$0xff]  ;;  %v225_v38 = vsel %vm203_vm1, %v723_v33, 0.0  ;;  %v733_v39 = vld [vmem:[%s667_s25 + $0x68] sm:$0xff]  ;;  %v738_v42 = vld [vmem:[%s667_s25 + $0x70] sm:$0xff] }
  0x13   : > { %586 = vmatpush3.msra.mxu0 %v274_v4  ;;  %v227_v41 = vsel %vm203_vm1, %v728_v36, 0.0  ;;  %v229_v44 = vsel %vm203_vm1, %v733_v39, 0.0  ;;  %v743_v45 = vld [vmem:[%s667_s25 + $0x78] sm:$0xff]  ;;  %v231_v47 = vsel %vm203_vm1, %v738_v42, 0.0  ;;  %v748_v48 = vld [vmem:[%s667_s25 + $0x80] sm:$0xff]  ;;  %v753_v51 = vld [vmem:[%s667_s25 + $0x88] sm:$0xff] }
  0x14   : > { %v210_v19 = vadd.f32 %v209_v14, %v208_v16  ;;  %v233_v50 = vsel %vm203_vm1, %v743_v45, 0.0  ;;  %v235_v53 = vsel %vm203_vm1, %v748_v48, 0.0  ;;  %v758_v54 = vld [vmem:[%s667_s25 + $0x90] sm:$0xff]  ;;  %v237_v56 = vsel %vm203_vm1, %v753_v51, 0.0  ;;  %v763_v57 = vld [vmem:[%s667_s25 + $0x98] sm:$0xff]  ;;  %v768_v60 = vld [vmem:[%s667_s25 + $0xa0] sm:$0xff] }
  0x15   : > { %v239_v59 = vsel %vm203_vm1, %v758_v54, 0.0  ;;  %v241_v62 = vsel %vm203_vm1, %v763_v57, 0.0  ;;  %v773_v63 = vld [vmem:[%s667_s25 + $0xa8] sm:$0xff]  ;;  %v243_v1 = vsel %vm203_vm1, %v768_v60, 0.0  ;;  %v778_v2 = vld [vmem:[%s667_s25 + $0xb0] sm:$0xff]  ;;  %v783_v9 = vld [vmem:[%s667_s25 + $0xb8] sm:$0xff] }
  0x16   : > { %v212_v22 = vadd.f32 %v211_v17, %v210_v19  ;;  %v245_v4 = vsel %vm203_vm1, %v773_v63, 0.0  ;;  %v247_v11 = vsel %vm203_vm1, %v778_v2, 0.0  ;;  %v788_v13 = vld [vmem:[%s667_s25 + $0xc0] sm:$0xff]  ;;  %v249_v16 = vsel %vm203_vm1, %v783_v9, 0.0  ;;  %v793_v17 = vld [vmem:[%s667_s25 + $0xc8] sm:$0xff] }
  0x18   : > { %v214_v25 = vadd.f32 %v213_v20, %v212_v22  ;;  %v251_v20 = vsel %vm203_vm1, %v788_v13, 0.0  ;;  %v798_v22 = vld [vmem:[%s667_s25 + $0xd0] sm:$0xff] }
  0x1a   : > { %v216_v28 = vadd.f32 %v215_v23, %v214_v25  ;;  %v253_v25 = vsel %vm203_vm1, %v793_v17, 0.0 }
  0x1c   : > { %v218_v31 = vadd.f32 %v217_v26, %v216_v28  ;;  %v803_v26 = vld [vmem:[%s667_s25 + $0xd8] sm:$0xff] }
  0x1e   : > { %v220_v34 = vadd.f32 %v219_v29, %v218_v31  ;;  %v255_v29 = vsel %vm203_vm1, %v798_v22, 0.0  ;;  %v808_v31 = vld [vmem:[%s667_s25 + $0xe0] sm:$0xff] }
  0x20   : > { %v222_v37 = vadd.f32 %v221_v32, %v220_v34  ;;  %v257_v34 = vsel %vm203_vm1, %v803_v26, 0.0 }
  0x22   : > { %v224_v40 = vadd.f32 %v223_v35, %v222_v37  ;;  %v813_v35 = vld [vmem:[%s667_s25 + $0xe8] sm:$0xff] }
  0x24   : > { %v226_v43 = vadd.f32 %v225_v38, %v224_v40  ;;  %v259_v38 = vsel %vm203_vm1, %v808_v31, 0.0  ;;  %v818_v40 = vld [vmem:[%s667_s25 + $0xf0] sm:$0xff] }
  0x26   : > { %v228_v46 = vadd.f32 %v227_v41, %v226_v43  ;;  %v261_v43 = vsel %vm203_vm1, %v813_v35, 0.0 }
  0x28   : > { %v230_v49 = vadd.f32 %v229_v44, %v228_v46  ;;  %v823_v44 = vld [vmem:[%s667_s25 + $0xf8] sm:$0xff] }
  0x2a   : > { %v232_v52 = vadd.f32 %v231_v47, %v230_v49  ;;  %v263_v47 = vsel %vm203_vm1, %v818_v40, 0.0 }
  0x2c   : > { %v234_v55 = vadd.f32 %v233_v50, %v232_v52  ;;  %v265_v50 = vsel %vm203_vm1, %v823_v44, 0.0 }
  0x2e   : > { %v236_v58 = vadd.f32 %v235_v53, %v234_v55 }
  0x30   : > { %v238_v61 = vadd.f32 %v237_v56, %v236_v58 }
  0x32   : > { %v240_v0 = vadd.f32 %v239_v59, %v238_v61 }
  0x34   : > { %v242_v3 = vadd.f32 %v241_v62, %v240_v0 }
  0x36   : > { %v244_v10 = vadd.f32 %v243_v1, %v242_v3  ;;  %v352_v1 = vld [vmem:[%s941_s2] sm:$0xff] }
  0x37   : > { %591 = vmatpush3.msra.mxu1 %v352_v1 }
  0x38   : > { %v246_v14 = vadd.f32 %v245_v4, %v244_v10 }
  0x3a   : > { %v248_v19 = vadd.f32 %v247_v11, %v246_v14 }
  0x3c   : > { %v250_v23 = vadd.f32 %v249_v16, %v248_v19 }
  0x3e   : > { %v252_v28 = vadd.f32 %v251_v20, %v250_v23  ;;  %v433_v23 = vlaneseq }
  0x40   : > { %v254_v32 = vadd.f32 %v253_v25, %v252_v28  ;;  %v434_v25 = vshrl.u32 %v433_v23, 7 }
  0x42   : > { %v256_v37 = vadd.f32 %v255_v29, %v254_v32  ;;  %v435_v28 = vsub.s32 0, %v434_v25 }
  0x44   : > { %v258_v41 = vadd.f32 %v257_v34, %v256_v37 }
  0x46   : > { %v260_v46 = vadd.f32 %v259_v38, %v258_v41 }
  0x48   : > { %v262_v49 = vadd.f32 %v261_v43, %v260_v46 }
  0x4a   : > { %v264_v52 = vadd.f32 %v263_v47, %v262_v49 }
  0x4c   : > { %v266_v53 = vadd.f32 %v265_v50, %v264_v52 }
  0x4e   : > { %v267_v55 = vrot.slane %v266_v53, 4 }
  0x50   : > { %v268_v56 = vadd.f32 %v267_v55, %v266_v53 }
  0x52   : > { %v269_v58 = vrot.slane %v268_v56, 2 }
  0x54   : > { %v270_v59 = vadd.f32 %v269_v58, %v268_v56 }
  0x56   : > { %v271_v61 = vrot.slane %v270_v59, 1 }
  0x58   : > { %v272_v62 = vadd.f32 %v271_v61, %v270_v59 }
  0x5a   : > { %v273_v0 = vmul.f32 0.00390625, %v272_v62 }
  0x5c   : > { %588 = vmatmul.mubr.msk.f32.vlgmr.msra.gmra.mxu0 %vm203_vm1, %v273_v0 }
 0x11c   : > { %v347_v3 = vpop.f32.mrf.mxu0 }
 0x11d   : > { %v351_v4 = vmax.f32 %v347_v3, 0.0 }
 0x11e   : > { %v589_v10 = vpop.f32.mrf.mxu0 }
 0x11f   : > { %593 = vmatmul.mubr.msk.f32.vlgmr.msra.gmra.mxu1 %vm353_vm2, %v351_v4 }
 0x1df   : > { %v423_v11 = vpop.f32.mrf.mxu1 }
 0x1e0   : > { %v567_v14 = vmul.f32 -1.442695, %v423_v11 }
 0x1e1   : > { %v594_v16 = vpop.f32.mrf.mxu1 }
 0x1e2   : > { %605 = vpow2.f32 %v567_v14 }
 0x1ef   : > { %v606_v19 = vpop.eup %605 }
 0x1f0   : > { %v430_v20 = vadd.f32 1.0, %v606_v19 }
 0x1f2   : > { %607 = vrcp.f32 %v430_v20 }
 0x1ff   : > { %v608_v29 = vpop.eup %607 }
 0x200   : > { %v436_v32 = vrot.slane %v608_v29, %v435_v28 }
 0x202   : > { %v437_v34 = vmul.f32 %v436_v32, %v670_v5  ;;  %v438_v37 = vmul.f32 %v436_v32, %v673_v6  ;;  %v439_v38 = vmul.f32 %v436_v32, %v676_v7  ;;  %v440_v41 = vmul.f32 %v436_v32, %v679_v8 }
 0x203   : > { %v441_v43 = vmul.f32 %v436_v32, %v688_v12  ;;  %v442_v46 = vmul.f32 %v436_v32, %v693_v15  ;;  %v443_v47 = vmul.f32 %v436_v32, %v698_v18  ;;  %v444_v49 = vmul.f32 %v436_v32, %v703_v21 }
 0x204   : > { %v445_v5 = vmul.f32 %v436_v32, %v708_v24  ;;  %v446_v6 = vmul.f32 %v436_v32, %v713_v27  ;;  %v447_v7 = vmul.f32 %v436_v32, %v718_v30  ;;  %v448_v8 = vmul.f32 %v436_v32, %v723_v33  ;;  %469 = vst.msk [vmem:[%s838_s30] sm:$0xff] %vm203_vm1, %v437_v34 }
 0x205   : > { %470 = vst.msk [vmem:[%s838_s30 + $0x8] sm:$0xff] %vm203_vm1, %v438_v37  ;;  %471 = vst.msk [vmem:[%s838_s30 + $0x10] sm:$0xff] %vm203_vm1, %v439_v38  ;;  %v449_v12 = vmul.f32 %v436_v32, %v728_v36  ;;  %v450_v15 = vmul.f32 %v436_v32, %v733_v39  ;;  %v451_v18 = vmul.f32 %v436_v32, %v738_v42 }
 0x206   : > { %472 = vst.msk [vmem:[%s838_s30 + $0x18] sm:$0xff] %vm203_vm1, %v440_v41  ;;  %v452_v21 = vmul.f32 %v436_v32, %v743_v45  ;;  %473 = vst.msk [vmem:[%s838_s30 + $0x20] sm:$0xff] %vm203_vm1, %v441_v43  ;;  %v453_v24 = vmul.f32 %v436_v32, %v748_v48  ;;  %v454_v27 = vmul.f32 %v436_v32, %v753_v51 }
 0x207   : > { %474 = vst.msk [vmem:[%s838_s30 + $0x28] sm:$0xff] %vm203_vm1, %v442_v46  ;;  %475 = vst.msk [vmem:[%s838_s30 + $0x30] sm:$0xff] %vm203_vm1, %v443_v47  ;;  %v455_v30 = vmul.f32 %v436_v32, %v758_v54  ;;  %v456_v33 = vmul.f32 %v436_v32, %v763_v57  ;;  %v457_v36 = vmul.f32 %v436_v32, %v768_v60 }
 0x208   : > { %476 = vst.msk [vmem:[%s838_s30 + $0x38] sm:$0xff] %vm203_vm1, %v444_v49  ;;  %477 = vst.msk [vmem:[%s838_s30 + $0x40] sm:$0xff] %vm203_vm1, %v445_v5  ;;  %v458_v39 = vmul.f32 %v436_v32, %v773_v63  ;;  %v459_v42 = vmul.f32 %v436_v32, %v778_v2  ;;  %v460_v45 = vmul.f32 %v436_v32, %v783_v9 }
 0x209   : > { %478 = vst.msk [vmem:[%s838_s30 + $0x48] sm:$0xff] %vm203_vm1, %v446_v6  ;;  %479 = vst.msk [vmem:[%s838_s30 + $0x50] sm:$0xff] %vm203_vm1, %v447_v7  ;;  %v461_v48 = vmul.f32 %v436_v32, %v788_v13  ;;  %v462_v51 = vmul.f32 %v436_v32, %v793_v17  ;;  %v463_v54 = vmul.f32 %v436_v32, %v798_v22 }
 0x20a   : > { %480 = vst.msk [vmem:[%s838_s30 + $0x58] sm:$0xff] %vm203_vm1, %v448_v8  ;;  %481 = vst.msk [vmem:[%s838_s30 + $0x60] sm:$0xff] %vm203_vm1, %v449_v12  ;;  %v464_v57 = vmul.f32 %v436_v32, %v803_v26  ;;  %v465_v60 = vmul.f32 %v436_v32, %v808_v31  ;;  %v466_v63 = vmul.f32 %v436_v32, %v813_v35 }
 0x20b   : > { %482 = vst.msk [vmem:[%s838_s30 + $0x68] sm:$0xff] %vm203_vm1, %v450_v15  ;;  %483 = vst.msk [vmem:[%s838_s30 + $0x70] sm:$0xff] %vm203_vm1, %v451_v18  ;;  %v467_v2 = vmul.f32 %v436_v32, %v818_v40  ;;  %v468_v9 = vmul.f32 %v436_v32, %v823_v44 }
 0x20c   : > { %484 = vst.msk [vmem:[%s838_s30 + $0x78] sm:$0xff] %vm203_vm1, %v452_v21  ;;  %485 = vst.msk [vmem:[%s838_s30 + $0x80] sm:$0xff] %vm203_vm1, %v453_v24 }
 0x20d   : > { %486 = vst.msk [vmem:[%s838_s30 + $0x88] sm:$0xff] %vm203_vm1, %v454_v27  ;;  %487 = vst.msk [vmem:[%s838_s30 + $0x90] sm:$0xff] %vm203_vm1, %v455_v30 }
 0x20e   : > { %488 = vst.msk [vmem:[%s838_s30 + $0x98] sm:$0xff] %vm203_vm1, %v456_v33  ;;  %489 = vst.msk [vmem:[%s838_s30 + $0xa0] sm:$0xff] %vm203_vm1, %v457_v36 }
 0x20f   : > { %490 = vst.msk [vmem:[%s838_s30 + $0xa8] sm:$0xff] %vm203_vm1, %v458_v39  ;;  %491 = vst.msk [vmem:[%s838_s30 + $0xb0] sm:$0xff] %vm203_vm1, %v459_v42 }
 0x210   : > { %492 = vst.msk [vmem:[%s838_s30 + $0xb8] sm:$0xff] %vm203_vm1, %v460_v45  ;;  %493 = vst.msk [vmem:[%s838_s30 + $0xc0] sm:$0xff] %vm203_vm1, %v461_v48 }
 0x211   : > { %494 = vst.msk [vmem:[%s838_s30 + $0xc8] sm:$0xff] %vm203_vm1, %v462_v51  ;;  %495 = vst.msk [vmem:[%s838_s30 + $0xd0] sm:$0xff] %vm203_vm1, %v463_v54 }
 0x212   : > { %496 = vst.msk [vmem:[%s838_s30 + $0xd8] sm:$0xff] %vm203_vm1, %v464_v57  ;;  %497 = vst.msk [vmem:[%s838_s30 + $0xe0] sm:$0xff] %vm203_vm1, %v465_v60 }
 0x213   : > { %498 = vst.msk [vmem:[%s838_s30 + $0xe8] sm:$0xff] %vm203_vm1, %v466_v63  ;;  %499 = vst.msk [vmem:[%s838_s30 + $0xf0] sm:$0xff] %vm203_vm1, %v467_v2 }
 0x214   : > { %500 = vst.msk [vmem:[%s838_s30 + $0xf8] sm:$0xff] %vm203_vm1, %v468_v9 }
 0x215 PF: > { %s13_s12 = sadd.s32 1, %s615_s12  }
 0x216   : > { %p10_p4 = scmp.ge.s32.totalorder %s13_s12, 4  }
 0x218   :  { %12 = sbr.rel (!%p10_p4) target bundleno = 1 (0x1), region = 62 }

</bundles_post_ra>
